<compile_context>
chip_gen: v7x
topology: tpu7x:2x2x1
jax: 0.10.0
libtpu: 0.0.40
codegen_flags: <defaults>
</compile_context>

<pallas_src>
import numpy as np
import jax
import jax.numpy as jnp
from jax.experimental import pallas as pl
from jax.experimental.pallas import tpu as pltpu

# ----------------------------- configuration ---------------------------------
MENTION_EMB = 32                       # `features` of mention embeddings
PAIR_EMB = 16                          # output dim of (synthetic) PairwiseEncoder
HIDDEN = 64                            # hidden dim of AnaphoricityScorer FFNN
IN_FEATURES = 3 * MENTION_EMB + PAIR_EMB   # 112
BIAS_ROW = IN_FEATURES                 # feats row 112 carries a constant 1.0 (b1 fold)
K_PAD = 128                            # contraction dim padded 113 -> 128 (MXU-friendly)
TOP_K = 4                              # config.top_k
BATCH_SIZE = 4                         # config.batch_size (WinBuilder window batch)
N_DIST_BUCKETS = 9                     # synthetic distance-bucket embedding table
LEAKY_SLOPE = 0.01                     # torch.nn.LeakyReLU default negative_slope
MAX_TILE_P = 8192                      # pair-axis tile (lanes) per grid step


def _round_up(x, m):
    return ((x + m - 1) // m) * m


def _cdiv(a, b):
    return (a + b - 1) // b


def _choose_tiling(n_pairs):
    """Pick (tile_p, p_pad): minimal lane padding, >=2 grid steps when possible (v7x)."""
    p128 = _round_up(max(n_pairs, 1), 128)
    num_tiles = _cdiv(p128, MAX_TILE_P)
    # v7x has 2 TensorCores; make sure the "parallel" pair axis has >= 2 grid steps
    # whenever the padded pair count allows it (a no-op perf-wise on v5e/v6e).
    if num_tiles == 1 and p128 >= 256:
        num_tiles = 2
    tile_p = _round_up(_cdiv(p128, num_tiles), 128)
    return tile_p, tile_p * num_tiles


# ----------------------------- Pallas kernel ----------------------------------
def _pair_scorer_kernel(feats_ref, w1t_ref, w2_ref, b2_ref, out_ref):
    """Fused WinBuilder._get_features + AnaphoricityScorer, lane-major.

    feats_ref : [K_PAD, TILE_P] bf16  columns = pairs (lanes); rows = [a,b,a*b,pf,1,0-pad]
    w1t_ref   : [HIDDEN, K_PAD] bf16  fused, transposed W1 (b1 folded into col BIAS_ROW)
    w2_ref    : [HIDDEN, 1]     f32
    b2_ref    : [1, 1]          f32
    out_ref   : [1, TILE_P]     f32   lane-dense score row
    """
    h = jnp.dot(w1t_ref[...], feats_ref[...],
                preferred_element_type=jnp.float32)                     # [H, TILE_P] f32
    h = jnp.where(h >= 0, h, LEAKY_SLOPE * h)                           # LeakyReLU (VPU)
    # W2 has N == 1: VPU multiply + sublane (XLU) reduce instead of a degenerate
    # 1-lane-wide MXU matmul; output stays lane-dense.
    out_ref[...] = jnp.sum(h * w2_ref[...], axis=0, keepdims=True) + b2_ref[...]


def _pair_buckets(pairs):
    # Synthetic PairwiseEncoder: log-bucketed mention-distance bucket ids.
    # TODO(synk): original PairwiseEncoder also uses doc genre / speaker features.
    d = (pairs[:, 1] - pairs[:, 0]).astype(jnp.float32)
    return jnp.clip(jnp.floor(jnp.log2(jnp.maximum(d, 1.0))).astype(jnp.int32),
                    0, N_DIST_BUCKETS - 1)


@jax.jit
def _score_all_pairs(mentions, pairs, dist_emb, w1t, w2, b2):
    """Score every mention pair in a single gridded, lane-major pallas_call."""
    P = pairs.shape[0]
    # Build the feature slab directly lane-major ([feat, pair]): no [P, 112] intermediate
    # and no explicit transpose of the biggest tensor in the pipeline.
    mt = mentions.T                                                      # [E, n]
    a_t = mt[:, pairs[:, 0]]                                             # [E, P]
    b_t = mt[:, pairs[:, 1]]                                             # [E, P]
    pf_t = dist_emb.T[:, _pair_buckets(pairs)]                           # [PE, P]
    ones = jnp.ones((1, P), jnp.float32)                                 # bias row (b1 fold)
    feats_t = jnp.concatenate([a_t, b_t, a_t * b_t, pf_t, ones], axis=0)  # [113, P]
    feats_t = feats_t.astype(jnp.bfloat16)        # halve the dominant feats HBM/DMA bytes

    tile_p, p_pad = _choose_tiling(P)
    feats_t = jnp.pad(feats_t, ((0, K_PAD - (IN_FEATURES + 1)), (0, p_pad - P)))

    grid = (p_pad // tile_p,)
    out = pl.pallas_call(
        _pair_scorer_kernel,
        out_shape=jax.ShapeDtypeStruct((1, p_pad), jnp.float32),
        grid_spec=pltpu.PrefetchScalarGridSpec(
            num_scalar_prefetch=0,
            grid=grid,
            in_specs=[
                pl.BlockSpec((K_PAD, tile_p), lambda i: (0, i)),   # features: tiled over pairs
                pl.BlockSpec((HIDDEN, K_PAD), lambda i: (0, 0)),   # weights: VMEM-resident
                pl.BlockSpec((HIDDEN, 1), lambda i: (0, 0)),
                pl.BlockSpec((1, 1), lambda i: (0, 0)),
            ],
            out_specs=pl.BlockSpec((1, tile_p), lambda i: (0, i)),
        ),
        compiler_params=pltpu.CompilerParams(
            dimension_semantics=("parallel",)),   # v7x: shard pair tiles over both TCs
    )(feats_t, w1t, w2, b2)
    return out[0, :P]


# ----------------------------- parameter init ---------------------------------
def init_params(key):
    ks = jax.random.split(key, 8)
    scale = 0.1
    w1a = scale * jax.random.normal(ks[1], (MENTION_EMB, HIDDEN), jnp.float32)
    w1b = scale * jax.random.normal(ks[2], (MENTION_EMB, HIDDEN), jnp.float32)
    w1s = scale * jax.random.normal(ks[3], (MENTION_EMB, HIDDEN), jnp.float32)
    w1p = scale * jax.random.normal(ks[4], (PAIR_EMB, HIDDEN), jnp.float32)
    b1 = scale * jax.random.normal(ks[5], (HIDDEN,), jnp.float32)
    # Fuse the four W1 blocks + fold b1 ONCE (host side):
    # [a | b | a*b | pf | 1] @ [W1a; W1b; W1s; W1p; b1] == one K=128 matmul incl. bias.
    w1 = jnp.concatenate([w1a, w1b, w1s, w1p, b1[None, :]], axis=0)      # [113, H]
    w1 = jnp.pad(w1, ((0, K_PAD - (IN_FEATURES + 1)), (0, 0)))           # [128, H]
    return {
        "dist_emb": scale * jax.random.normal(ks[0], (N_DIST_BUCKETS, PAIR_EMB), jnp.float32),
        "w1t": w1.T.astype(jnp.bfloat16),                                # [H, 128] lane-major
        "w2":  scale * jax.random.normal(ks[6], (HIDDEN, 1), jnp.float32),
        "b2":  scale * jax.random.normal(ks[7], (1, 1), jnp.float32),
    }


# ------------------- all-pairs score table (one launch, one fetch) --------------
def _enumerate_pairs(n_mentions):
    # All pairs (p, p + ws) for ws in [1, n-1], i.e. every pair p < q <= n-1.
    return np.array([(p, p + ws) for ws in range(1, n_mentions)
                     for p in range(n_mentions - ws)], dtype=np.int32).reshape(-1, 2)


def score_table_for(mentions, params):
    n = int(mentions.shape[0])
    pairs = _enumerate_pairs(n)
    table = np.zeros((n, n), np.float32)
    if pairs.shape[0] == 0:
        return table
    scores = _score_all_pairs(mentions, jnp.asarray(pairs),
                              params["dist_emb"], params["w1t"],
                              params["w2"], params["b2"])
    # The single device -> host transfer of the whole forward pass.
    table[pairs[:, 0], pairs[:, 1]] = np.asarray(jax.block_until_ready(scores))
    return table


# ----------------------------- WinBuilder.forward (host glue) -------------------
def win_builder_np(score_table, global_struct, global_scores, windows_size, n_mentions):
    K = global_struct.shape[0]
    n_windows = n_mentions - windows_size
    struct_lst, scores_lst = [], []
    for i in range(1, n_windows + 1, BATCH_SIZE):
        gsb = global_struct[:, i:i + BATCH_SIZE + windows_size]
        gscb = global_scores[:, i:i + BATCH_SIZE + windows_size]
        rbs = gsb.shape[1] - windows_size
        # torch.unfold(dim=1, size=ws+1, step=1) -> [K, rbs, ws+1]
        lsb = np.stack([gsb[:, w:w + windows_size + 1] for w in range(rbs)], axis=1)
        local_scores_batch = gscb[:, -rbs:]
        new_link = np.broadcast_to(
            np.arange(i, i + rbs, dtype=np.float32).reshape(1, rbs, 1), (K, rbs, 1))
        lsb_append = np.concatenate([lsb[:, :, :windows_size], new_link], axis=2)
        # Pair scores were precomputed by the single Pallas launch: pairs (j-1, j-1+ws).
        p = np.arange(i, i + rbs) - 1
        new_link_scores = score_table[p, p + windows_size]               # [rbs]
        scores_append = np.broadcast_to(new_link_scores.reshape(1, rbs), (K, rbs))
        struct_lst.append(np.concatenate([lsb, lsb_append], axis=0))
        scores_lst.append(np.concatenate([local_scores_batch, scores_append], axis=0))
    local_struct = np.transpose(np.concatenate(struct_lst, axis=1), (1, 0, 2))   # kwl->wkl
    local_scores = np.transpose(np.concatenate(scores_lst, axis=1), (1, 0))      # kw->wk
    return local_struct, local_scores


# ----------------------------- beam search (host glue) --------------------------
def _dedup_np(gs, gsc, gsum):
    # torch.unique(dim=0) on [struct | scores | sum] rows (sorted, duplicates removed).
    # Data-dependent output shape -> stays on host (arrays are <= topk rows).
    data = np.unique(np.concatenate([gs, gsc, gsum.reshape(-1, 1)], axis=1), axis=0)
    ns, nc = gs.shape[1], gsc.shape[1]
    return data[:, :ns], data[:, ns:ns + nc], data[:, -1]


def beam_search_np(local_structs, local_scores, first_window_struct,
                   first_window_scores, topk):
    n_windows = local_structs.shape[0]
    gs = np.concatenate([first_window_struct, first_window_struct], axis=0)
    gsc = np.concatenate([first_window_scores, first_window_scores], axis=0)
    gs = np.concatenate([gs, local_structs[0, :, -1].reshape(-1, 1)], axis=1)
    gsc = np.concatenate([gsc, local_scores[0, :].reshape(-1, 1)], axis=1)
    gsum = gsc.sum(axis=1)
    k = min(topk, gsum.shape[0])
    topi = np.argsort(-gsum, kind="stable")[:k]          # torch.topk(sorted=True)
    gs, gsc, gsum = gs[topi], gsc[topi], gsum[topi]
    gs, gsc, gsum = _dedup_np(gs, gsc, gsum)
    for i in range(1, n_windows):
        cand_s, cand_sc = local_structs[i], local_scores[i]
        G, C = gs.shape[0], cand_s.shape[0]
        j = np.arange(G * C)
        # Faithful to the reference torch code: global.repeat(C,1) row j = beam (j % G),
        # candidate[...].repeat(G) element j = candidate (j % C).  The reference therefore
        # only enumerates the full GxC product when gcd(G, C) == 1; we reproduce that
        # exact behavior (same rows, same order) rather than "fixing" it.
        gi, ci = j % G, j % C
        gs = np.concatenate([gs[gi], cand_s[ci, -1].reshape(-1, 1)], axis=1)
        gsc = np.concatenate([gsc[gi], cand_sc[ci].reshape(-1, 1)], axis=1)
        gsum = gsum[gi] + cand_sc[ci]
        k = min(topk, gsum.shape[0])
        topi = np.argsort(-gsum, kind="stable")[:k]
        gs, gsc, gsum = gs[topi], gsc[topi], gsum[topi]
        gs, gsc, gsum = _dedup_np(gs, gsc, gsum)
    return gs, gsc


# ----------------------------- WinDecoder.forward -------------------------------
def win_decoder_forward(mentions, params, topk=TOP_K):
    n_mentions = int(mentions.shape[0])
    table = score_table_for(mentions, params)            # ONE Pallas launch + ONE fetch
    global_struct = np.zeros((1, n_mentions + 1), np.float32)
    global_scores = np.zeros((1, n_mentions + 1), np.float32)
    for windows_size in range(1, n_mentions):
        local_struct, local_scores = win_builder_np(
            table, global_struct, global_scores, windows_size, n_mentions)
        prev = windows_size - 1
        fws = global_struct[:, :prev + 2]
        fwsc = global_scores[:, :prev + 2]
        global_struct, global_scores = beam_search_np(
            local_struct, local_scores, fws, fwsc, topk)
    return jnp.asarray(global_struct), jnp.asarray(global_scores)


# ----------------------------------- main ---------------------------------------
if __name__ == "__main__":
    key = jax.random.PRNGKey(0)
    k_param, k_data = jax.random.split(key)
    params = init_params(k_param)
    n_mentions = 6
    mentions = jax.random.normal(k_data, (n_mentions, MENTION_EMB), jnp.float32)

    # --- run the batched Pallas scorer once and check against a pure-JAX reference ---
    pairs_j = jnp.asarray(_enumerate_pairs(n_mentions))
    scores = _score_all_pairs(mentions, pairs_j, params["dist_emb"], params["w1t"],
                              params["w2"], params["b2"])
    scores = np.asarray(jax.block_until_ready(scores))

    a = mentions[pairs_j[:, 0]]
    b = mentions[pairs_j[:, 1]]
    pf = params["dist_emb"][_pair_buckets(pairs_j)]
    ones = jnp.ones((pairs_j.shape[0], 1), jnp.float32)
    feats = jnp.concatenate([a, b, a * b, pf, ones], axis=1)             # [P, 113]
    feats = jnp.pad(feats, ((0, 0), (0, K_PAD - (IN_FEATURES + 1))))     # [P, 128]
    w1t_f32 = params["w1t"].astype(jnp.float32)                          # [H, 128]
    h_ref = feats @ w1t_f32.T                                            # bias folded in
    h_ref = jnp.where(h_ref >= 0, h_ref, LEAKY_SLOPE * h_ref)
    ref = np.asarray(h_ref @ params["w2"] + params["b2"])[:, 0]
    assert np.allclose(scores, ref, atol=5e-2, rtol=5e-2), (
        f"kernel mismatch: max|diff|={np.max(np.abs(scores - ref))}")

    # --- full WinDecoder forward (beam search driven by the precomputed score table) ---
    global_struct, global_scores = win_decoder_forward(mentions, params)
    jax.block_until_ready(global_struct)
    jax.block_until_ready(global_scores)
    assert global_struct.shape[1] == n_mentions + 1
    assert global_scores.shape == global_struct.shape
    print("KERNEL_OK")
</pallas_src>

<mosaic_0001>
module attributes {stable_mosaic.version = 11 : i64} {
  func.func @_pair_scorer_kernel(%arg0: i32, %arg1: memref<128x128xbf16, #tpu.memory_space<vmem>>, %arg2: memref<64x128xbf16, #tpu.memory_space<vmem>>, %arg3: memref<64x1xf32, #tpu.memory_space<vmem>>, %arg4: memref<1x1xf32, #tpu.memory_space<vmem>>, %arg5: memref<1x128xf32, #tpu.memory_space<vmem>>) attributes {dimension_semantics = [#tpu.dimension_semantics<parallel>], iteration_bounds = array<i64: 1>, scalar_prefetch = 0 : i64, scratch_operands = 0 : i64, tpu.core_type = #tpu.core_type<tc>, window_params = [{transform_indices = @transform_0, window_bounds = array<i64: 128, 128>}, {pipeline_mode = #tpu.pipeline_mode<synchronous>, transform_indices = @transform_1, window_bounds = array<i64: 64, 128>}, {pipeline_mode = #tpu.pipeline_mode<synchronous>, transform_indices = @transform_2, window_bounds = array<i64: 64, 1>}, {pipeline_mode = #tpu.pipeline_mode<synchronous>, transform_indices = @transform_3, window_bounds = array<i64: 1, 1>}, {transform_indices = @transform_4, window_bounds = array<i64: 1, 128>}]} {
    %c0 = arith.constant 0 : index
    %c0_0 = arith.constant 0 : index
    %0 = vector.load %arg2[%c0, %c0_0] : memref<64x128xbf16, #tpu.memory_space<vmem>>, vector<64x128xbf16>
    %c0_1 = arith.constant 0 : index
    %c0_2 = arith.constant 0 : index
    %1 = vector.load %arg1[%c0_1, %c0_2] : memref<128x128xbf16, #tpu.memory_space<vmem>>, vector<128x128xbf16>
    %cst = arith.constant dense<0.000000e+00> : vector<64x128xf32>
    %2 = tpu.matmul %0, %1, %cst {dimension_numbers = #tpu.dot_dimension_numbers<[1], [0], [0], [1], [0, 0, 1, 1], [], []>} : vector<64x128xbf16>, vector<128x128xbf16>, vector<64x128xf32> -> vector<64x128xf32>
    %cst_3 = arith.constant 0.000000e+00 : f32
    %3 = vector.broadcast %cst_3 : f32 to vector<64x128xf32>
    %4 = arith.cmpf oge, %2, %3 : vector<64x128xf32>
    %cst_4 = arith.constant 0.00999999977 : f32
    %5 = vector.broadcast %cst_4 : f32 to vector<64x128xf32>
    %6 = arith.mulf %5, %2 : vector<64x128xf32>
    %7 = arith.select %4, %2, %6 : vector<64x128xi1>, vector<64x128xf32>
    %c0_5 = arith.constant 0 : index
    %c0_6 = arith.constant 0 : index
    %8 = vector.load %arg3[%c0_5, %c0_6] : memref<64x1xf32, #tpu.memory_space<vmem>>, vector<64x1xf32>
    %9 = vector.broadcast %8 : vector<64x1xf32> to vector<64x128xf32>
    %10 = arith.mulf %7, %9 : vector<64x128xf32>
    %cst_7 = arith.constant dense<0.000000e+00> : vector<128xf32>
    %11 = vector.multi_reduction <add>, %10, %cst_7 [0] : vector<64x128xf32> to vector<128xf32>
    %12 = vector.shape_cast %11 : vector<128xf32> to vector<1x128xf32>
    %c0_8 = arith.constant 0 : index
    %c0_9 = arith.constant 0 : index
    %13 = vector.load %arg4[%c0_8, %c0_9] : memref<1x1xf32, #tpu.memory_space<vmem>>, vector<1x1xf32>
    %14 = vector.broadcast %13 : vector<1x1xf32> to vector<1x128xf32>
    %15 = arith.addf %12, %14 : vector<1x128xf32>
    %c0_10 = arith.constant 0 : index
    %c0_11 = arith.constant 0 : index
    %16 = vector.load %arg5[%c0_10, %c0_11] : memref<1x128xf32, #tpu.memory_space<vmem>>, vector<1x128xf32>
    tpu.vector_store %arg5[%c0_10, %c0_11], %15 {strides = array<i32>} : memref<1x128xf32, #tpu.memory_space<vmem>>, vector<1x128xf32>,
    return
  }
  func.func @transform_0(%arg0: i32) -> (i32, i32) {
    %c0_i32 = arith.constant 0 : i32
    %c0_i32_0 = arith.constant 0 : i32
    return %c0_i32, %arg0 : i32, i32
  }
  func.func @transform_1(%arg0: i32) -> (i32, i32) {
    %c0_i32 = arith.constant 0 : i32
    %c0_i32_0 = arith.constant 0 : i32
    %c0_i32_1 = arith.constant 0 : i32
    return %c0_i32, %c0_i32_0 : i32, i32
  }
  func.func @transform_2(%arg0: i32) -> (i32, i32) {
    %c0_i32 = arith.constant 0 : i32
    %c0_i32_0 = arith.constant 0 : i32
    %c0_i32_1 = arith.constant 0 : i32
    return %c0_i32, %c0_i32_0 : i32, i32
  }
  func.func @transform_3(%arg0: i32) -> (i32, i32) {
    %c0_i32 = arith.constant 0 : i32
    %c0_i32_0 = arith.constant 0 : i32
    %c0_i32_1 = arith.constant 0 : i32
    return %c0_i32, %c0_i32_0 : i32, i32
  }
  func.func @transform_4(%arg0: i32) -> (i32, i32) {
    %c0_i32 = arith.constant 0 : i32
    %c0_i32_0 = arith.constant 0 : i32
    return %c0_i32, %arg0 : i32, i32
  }
}

</mosaic_0001>

<bundles_post_ra>
// kernel: _score_all_pairs.1
= control target key start
LH: loop header
LB: loop body
LE: loop exit
PB: predicated region body
PF: predicated region fallthrough
CT: control target
= control target key end

     0   :  { %v369_v1 = vmov 0   ;;  %s461_s0 = inlined_call_operand.vmem [shape: bf16[128,128], index: 0, kind: input, shape index: {}]   ;;  %s462_s3 = inlined_call_operand.<no memory space> [shape: f32[1,1], index: 3, kind: input, shape index: {}]   ;;  %s463_s1 = inlined_call_operand.vmem [shape: bf16[64,128], index: 1, kind: input, shape index: {}]   ;;  %s464_s2 = inlined_call_operand.vmem [shape: f32[64,1], index: 2, kind: input, shape index: {}]   ;;  %s465_s4 = inlined_call_operand.vmem [shape: f32[1,128], index: 4, kind: output, shape index: {}]  }
   0x1   :  { %v357_v0 = vld [vmem:[%s461_s0] sm:$0xff]   ;;  %355 = vset.pattern.permute.xlu0 %v369_v1  ;;  %356 = vset.pattern.permute.xlu1 %v369_v1  ;;  %v9_v2 = vstv %s462_s3  ;;  %v358_v3 = vld [vmem:[%s461_s0 + $0x8] sm:$0xff]   ;;  %v359_v4 = vld [vmem:[%s461_s0 + $0x10] sm:$0xff]  }
   0x2   :  { %10 = vst [vmem:[#allocation2] sm:$0x1] %v9_v2  ;;  %314 = vmatprep.subr.bf16.mxu0 %v357_v0  ;;  %338 = vmatprep.subr.bf16.mxu1 %v357_v0  ;;  %v360_v5 = vld [vmem:[%s461_s0 + $0x18] sm:$0xff]   ;;  %v365_v6 = vld [vmem:[%s463_s1] sm:$0xff]   ;;  %v366_v7 = vld [vmem:[%s463_s1 + $0x10] sm:$0xff]  }
   0x3   :  { %315 = vmatpush3.bf16.msra.mxu0 %v357_v0  ;;  %346 = vmatpush3.bf16.msra.mxu1 %v357_v0  ;;  %v361_v8 = vld [vmem:[%s461_s0 + $0x20] sm:$0xff]   ;;  %v207_v10 = vld [vmem:[%s464_s2 + $0x10] sm:$0xff]  ;;  %v206_v11 = vld [vmem:[%s464_s2 + $0x8] sm:$0xff] }
   0x4   :  { %316 = vmatprep.subr.bf16.mxu0 %v358_v3  ;;  %339 = vmatprep.subr.bf16.mxu1 %v358_v3  ;;  %v205_v9 = vld [vmem:[%s464_s2] sm:$0xff]  ;;  %v208_v12 = vld [vmem:[%s464_s2 + $0x18] sm:$0xff]  ;;  %v362_v13 = vld [vmem:[%s461_s0 + $0x28] sm:$0xff]  }
   0x5   :  { %330 = vmatprep.mubr.bf16.mxu0 %v365_v6  ;;  %334 = vmatprep.mubr.bf16.mxu1 %v366_v7  ;;  %v209_v14 = vld [vmem:[%s464_s2 + $0x20] sm:$0xff]  ;;  %v210_v15 = vld [vmem:[%s464_s2 + $0x28] sm:$0xff]  ;;  %v363_v16 = vld [vmem:[%s461_s0 + $0x30] sm:$0xff]  }
   0x6   :  { %215 = vperm.xlu0 %355, %v205_v9   ;;  %225 = vperm.xlu1 %356, %v207_v10   ;;  %v211_v17 = vld [vmem:[%s464_s2 + $0x30] sm:$0xff]  ;;  %v212_v18 = vld [vmem:[%s464_s2 + $0x38] sm:$0xff]  ;;  %v367_v21 = vld [vmem:[%s463_s1 + $0x8] sm:$0xff]  }
   0x7   :  { %317 = vmatpush3.bf16.msra.mxu0 %v358_v3  ;;  %347 = vmatpush3.bf16.msra.mxu1 %v358_v3  ;;  %v364_v19 = vld [vmem:[%s461_s0 + $0x38] sm:$0xff]  }
   0x8   :  { %318 = vmatprep.subr.bf16.mxu0 %v359_v4  ;;  %340 = vmatprep.subr.bf16.mxu1 %v359_v4  ;;  %v368_v22 = vld [vmem:[%s463_s1 + $0x18] sm:$0xff]  }
   0x9   :  { %v274_v20 = vld [vmem:[#allocation2] sm:$0x1] }
   0xa   :  { %220 = vperm.xlu0 %355, %v206_v11   ;;  %230 = vperm.xlu1 %356, %v208_v12  }
   0xb   :  { %319 = vmatpush3.bf16.msra.mxu0 %v359_v4  ;;  %348 = vmatpush3.bf16.msra.mxu1 %v359_v4 }
   0xc   :  { %320 = vmatprep.subr.bf16.mxu0 %v360_v5  ;;  %341 = vmatprep.subr.bf16.mxu1 %v360_v5 }
   0xe   :  { %235 = vperm.xlu0 %355, %v209_v14   ;;  %240 = vperm.xlu1 %356, %v210_v15  }
   0xf   :  { %321 = vmatpush3.bf16.msra.mxu0 %v360_v5  ;;  %349 = vmatpush3.bf16.msra.mxu1 %v360_v5  ;;  %v280_v5 = vlaneseq }
  0x10   :  { %322 = vmatprep.subr.bf16.mxu0 %v361_v8  ;;  %342 = vmatprep.subr.bf16.mxu1 %v361_v8 }
  0x12   :  { %245 = vperm.xlu0 %355, %v211_v17   ;;  %250 = vperm.xlu1 %356, %v212_v18  }
  0x13   :  { %323 = vmatpush3.bf16.msra.mxu0 %v361_v8  ;;  %350 = vmatpush3.bf16.msra.mxu1 %v361_v8  ;;  %v281_v8 = vshrl.u32 %v280_v5, 7 }
  0x14   :  { %324 = vmatprep.subr.bf16.mxu0 %v362_v13  ;;  %343 = vmatprep.subr.bf16.mxu1 %v362_v13 }
  0x15   :  { %v282_v11 = vsub.s32 0, %v281_v8 }
  0x16   :  { %277 = vperm.xlu0 %355, %v274_v20  }
  0x17   :  { %325 = vmatpush3.bf16.msra.mxu0 %v362_v13  ;;  %351 = vmatpush3.bf16.msra.mxu1 %v362_v13 }
  0x18   :  { %326 = vmatprep.subr.bf16.mxu0 %v363_v16  ;;  %344 = vmatprep.subr.bf16.mxu1 %v363_v16 }
  0x1b   :  { %327 = vmatpush3.bf16.msra.mxu0 %v363_v16  ;;  %352 = vmatpush3.bf16.msra.mxu1 %v363_v16 }
  0x1c   :  { %328 = vmatprep.subr.bf16.mxu0 %v364_v19  ;;  %345 = vmatprep.subr.bf16.mxu1 %v364_v19 }
  0x1f   :  { %329 = vmatpush3.bf16.msra.mxu0 %v364_v19  ;;  %353 = vmatpush3.bf16.msra.mxu1 %v364_v19 }
  0x22   :  { %331 = vmatmul.mubr.bf16.vlgmr.msra.gmra.mrb[0].mxu0 %v367_v21  ;;  %335 = vmatmul.mubr.bf16.vlgmr.msra.gmra.mrb[0].mxu1 %v368_v22 }
  0x85   :  { %v216_v25 = vpop.permute.xlu0 %215  ;;  %v226_v26 = vpop.permute.xlu1 %225 }
  0x89   :  { %v221_v35 = vpop.permute.xlu0 %220  ;;  %v231_v36 = vpop.permute.xlu1 %230 }
  0x8d   :  { %v236_v49 = vpop.permute.xlu0 %235  ;;  %v241_v52 = vpop.permute.xlu1 %240 }
  0x91   :  { %v246_v62 = vpop.permute.xlu0 %245  ;;  %v251_v63 = vpop.permute.xlu1 %250 }
  0x95   :  { %v278_v13 = vpop.permute.xlu0 %277 }
  0x96   :  { %v283_v15 = vrot.slane %v278_v13, %v282_v11 }
  0xf5   :  { %v332_v23 = vpop.f32.mrb[0].mxu0  ;;  %v336_v24 = vpop.f32.mrb[0].mxu1 }
  0xf6   :  { %v150_v27 = vpop.f32.mrb[1].mxu0  ;;  %v166_v28 = vpop.f32.mrb[1].mxu1  ;;  %v191_v34 = vmul.f32 0.01, %v332_v23  ;;  %vm183_vm1 = vcmp.ge.f32.partialorder %v332_v23, 0.0  ;;  %vm187_vm6 = vcmp.ge.f32.partialorder %v336_v24, 0.0 }
  0xf7   :  { %v189_v29 = vmul.f32 0.01, %v150_v27  ;;  %v333_v30 = vpop.f32.mrb[2].mxu0  ;;  %v337_v31 = vpop.f32.mrb[2].mxu1  ;;  %vm181_vm0 = vcmp.ge.f32.partialorder %v150_v27, 0.0  ;;  %vm185_vm4 = vcmp.ge.f32.partialorder %v166_v28, 0.0 }
  0xf8   :  { %v153_v32 = vpop.f32.mrb[3].mxu0  ;;  %v169_v33 = vpop.f32.mrb[3].mxu1  ;;  %v192_v38 = vmul.f32 0.01, %v333_v30  ;;  %vm184_vm3 = vcmp.ge.f32.partialorder %v333_v30, 0.0  ;;  %v199_v40 = vsel %vm183_vm1, %v332_v23, %v191_v34  ;;  %vm188_vm7 = vcmp.ge.f32.partialorder %v337_v31, 0.0 }
  0xf9   :  { %vm182_vm2 = vcmp.ge.f32.partialorder %v153_v32, 0.0  ;;  %v197_v37 = vsel %vm181_vm0, %v150_v27, %v189_v29  ;;  %v190_v39 = vmul.f32 0.01, %v153_v32  ;;  %v193_v41 = vmul.f32 0.01, %v166_v28 }
  0xfa   :  { %v253_v43 = vmul.f32 %v216_v25, %v197_v37  ;;  %v200_v45 = vsel %vm184_vm3, %v333_v30, %v192_v38  ;;  %v194_v46 = vmul.f32 0.01, %v169_v33  ;;  %v255_v47 = vmul.f32 %v226_v26, %v199_v40 }
  0xfb   :  { %v198_v42 = vsel %vm182_vm2, %v153_v32, %v190_v39  ;;  %vm186_vm5 = vcmp.ge.f32.partialorder %v169_v33, 0.0  ;;  %v195_v50 = vmul.f32 0.01, %v336_v24  ;;  %v201_v51 = vsel %vm185_vm4, %v166_v28, %v193_v41 }
  0xfc   :  { %v254_v44 = vmul.f32 %v221_v35, %v198_v42  ;;  %v256_v53 = vmul.f32 %v231_v36, %v200_v45  ;;  %v196_v55 = vmul.f32 0.01, %v337_v31  ;;  %v202_v56 = vsel %vm186_vm5, %v169_v33, %v194_v46 }
  0xfd   :  { %v257_v57 = vmul.f32 %v236_v49, %v201_v51  ;;  %v203_v59 = vsel %vm187_vm6, %v336_v24, %v195_v50  ;;  %v258_v60 = vmul.f32 %v241_v52, %v202_v56 }
  0xfe   :  { %v261_v48 = vadd.f32 %v254_v44, %v253_v43  ;;  %v204_v0 = vsel %vm188_vm7, %v337_v31, %v196_v55  ;;  %v259_v1 = vmul.f32 %v246_v62, %v203_v59 }
  0xff   :  { %v260_v3 = vmul.f32 %v251_v63, %v204_v0 }
 0x100   :  { %v262_v54 = vadd.f32 %v261_v48, %v255_v47 }
 0x102   :  { %v263_v58 = vadd.f32 %v262_v54, %v256_v53 }
 0x104   :  { %v264_v61 = vadd.f32 %v263_v58, %v257_v57 }
 0x106   :  { %v265_v2 = vadd.f32 %v264_v61, %v258_v60 }
 0x108   :  { %v266_v4 = vadd.f32 %v265_v2, %v259_v1 }
 0x10a   :  { %v267_v6 = vadd.f32 %v266_v4, %v260_v3 }
 0x10c   :  { %v268_v7 = vrot.slane %v267_v6, 4 }
 0x10e   :  { %v269_v9 = vadd.f32 %v268_v7, %v267_v6 }
 0x110   :  { %v270_v10 = vrot.slane %v269_v9, 2 }
 0x112   :  { %v271_v12 = vadd.f32 %v270_v10, %v269_v9 }
 0x114   :  { %v272_v14 = vrot.slane %v271_v12, 1 }
 0x116   :  { %v273_v16 = vadd.f32 %v272_v14, %v271_v12 }
 0x118   :  { %v284_v17 = vadd.f32 %v283_v15, %v273_v16 }
 0x11a   :  { %285 = vst [vmem:[%s465_s4] sm:$0x1] %v284_v17 }

</bundles_post_ra>
